<compile_context>
chip_gen: v7x
topology: tpu7x:2x2x1
jax: 0.10.0
libtpu: 0.0.40
codegen_flags: <defaults>
</compile_context>

<pallas_src>
import jax
import jax.numpy as jnp
from jax.experimental import pallas as pl
from jax.experimental.pallas import tpu as pltpu


# ---------------------------------------------------------------------------
# Kernels
# ---------------------------------------------------------------------------

def _residual_add_kernel(y_ref, x_ref, o_ref):
    # o = fn(x) + x with fn(x)=y precomputed outside (arbitrary fn).
    # Cast per-tile in VMEM (free for a mem-bound kernel) and add in the
    # promoted (output) dtype -> matches PyTorch's type-promotion for `+`.
    y = y_ref[...].astype(o_ref.dtype)
    x = x_ref[...].astype(o_ref.dtype)
    o_ref[...] = y + x


def _make_fused_kernel(fn):
    # o = fn(x) + x with a purely elementwise `fn` traced into the kernel:
    # one HBM round trip (read x, write o).
    def kernel(x_ref, o_ref):
        x = x_ref[...]
        if jnp.issubdtype(x.dtype, jnp.floating):
            # Single upcast per tile; avoids repeated per-op promotion casts
            # (v5e has no bf16 VPU/EUP).
            x = x.astype(jnp.float32)
        o_ref[...] = (fn(x) + x).astype(o_ref.dtype)
    return kernel


# ---------------------------------------------------------------------------
# Tiling plan
# ---------------------------------------------------------------------------

def _chip_budget():
    """(per-buffer tile bytes, vmem_limit_bytes) per TPU generation."""
    try:
        kind = jax.devices()[0].device_kind.lower()
    except Exception:  # pragma: no cover - defensive
        kind = ""
    if "v7" in kind:
        # 64 MiB physical VMEM: ~4 MiB/buffer; worst case 3 arrays x 2 bufs = 24 MiB.
        return 4 * 1024 * 1024, 40 * 1024 * 1024
    # v5e / v6e: 128 MiB physical VMEM: ~8 MiB/buffer; worst case 48 MiB.
    return 8 * 1024 * 1024, 64 * 1024 * 1024


def _plan(total, max_itemsize, min_itemsize):
    """Lane-dense 2-D plan: (lane, rows, tile_rows, grid, padded, vmem_limit)."""
    # dtype-aware sublane multiple: f32 -> 8, bf16 -> 16, int8/fp8 -> 32.
    sub = max(8, 32 // max(min_itemsize, 1))
    tile_bytes, vmem_limit = _chip_budget()

    lane = None
    for cand in (512, 256, 128):          # lane-dense (multiple of 128)
        if total % cand == 0:
            lane = cand
            break
    padded = lane is None
    if padded:
        lane = 128                        # last resort: pad (costs extra HBM traffic)
    rows = pl.cdiv(total, lane)

    # Row tile: as many rows as fit the per-buffer byte budget, sublane-aligned.
    cap = max(sub, (tile_bytes // (lane * max_itemsize)) // sub * sub)
    if rows <= cap:
        if rows >= 2 * sub:
            # Guarantee >= 2 row tiles so the "parallel" grid axis can shard
            # across both v7x TensorCores (per-TC HBM bandwidth).
            tile_rows = min(rows, pl.cdiv(pl.cdiv(rows, 2), sub) * sub)
        else:
            tile_rows = rows              # tiny tensor: full-dim block, grid = 1
    else:
        tile_rows = cap
    grid = pl.cdiv(rows, tile_rows)
    return lane, rows, tile_rows, grid, padded, vmem_limit


# ---------------------------------------------------------------------------
# pallas_call wrapper
# ---------------------------------------------------------------------------

def _pallas_elementwise(kernel, operands, out_dtype, orig_shape, *,
                        alias_first_input=False):
    total = int(operands[0].size)
    itemsizes = [jnp.dtype(op.dtype).itemsize for op in operands]
    itemsizes.append(jnp.dtype(out_dtype).itemsize)
    lane, rows, tile_rows, grid, padded, vmem_limit = _plan(
        total, max(itemsizes), min(itemsizes))

    if padded:
        # TODO(synk): only hit when x.size is not a multiple of 128; the pad and
        # the final slice each cost an extra HBM round trip per operand.
        pad = rows * lane - total
        slabs = [jnp.pad(op.reshape(-1), (0, pad)).reshape(rows, lane)
                 for op in operands]
    else:
        # Free (metadata-only) reshape to a lane-dense slab.
        slabs = [op.reshape(rows, lane) for op in operands]

    spec = pl.BlockSpec((tile_rows, lane), lambda i: (i, 0))
    call_kwargs = {}
    if alias_first_input and slabs[0].dtype == jnp.dtype(out_dtype):
        # Reuse fn(x)'s HBM buffer for the output (no extra full-size allocation
        # under jit; bandwidth-neutral).
        call_kwargs["input_output_aliases"] = {0: 0}

    out = pl.pallas_call(
        kernel,
        out_shape=jax.ShapeDtypeStruct((rows, lane), out_dtype),
        grid_spec=pltpu.PrefetchScalarGridSpec(
            num_scalar_prefetch=0,
            grid=(grid,),
            in_specs=[spec] * len(slabs),
            out_specs=spec,
        ),
        compiler_params=pltpu.CompilerParams(
            dimension_semantics=("parallel",),   # independent row tiles -> megacore
            vmem_limit_bytes=vmem_limit,
        ),
        **call_kwargs,
    )(*slabs)

    if padded:
        out = out.reshape(-1)[:total]
    return out.reshape(orig_shape)


# ---------------------------------------------------------------------------
# Residual.forward
# ---------------------------------------------------------------------------

def residual(fn, x, *args, fuse=False, **kwargs):
    """Residual.forward: fn(x, *args, **kwargs) + x.

    fuse=True : `fn` must be a purely elementwise, shape-preserving function of
                a single tensor; it is traced inside the Pallas kernel so
                fn(x)+x is a single HBM round trip (2N bytes).
    fuse=False: `fn` runs as ordinary JAX (arbitrary sub-module) and only the
                residual add runs as a Pallas kernel.
    """
    if fuse:
        assert not args and not kwargs, "fused path supports fn(x) only"
        return _pallas_elementwise(_make_fused_kernel(fn), [x], x.dtype, x.shape)

    y = fn(x, *args, **kwargs)
    assert y.shape == x.shape, (y.shape, x.shape)
    out_dtype = jnp.promote_types(y.dtype, x.dtype)  # PyTorch add promotion
    # TODO(synk): arbitrary (non-elementwise) `fn` sub-modules (conv / attention
    # blocks in diffusion.py) have no generic Pallas translation here; they run
    # as plain JAX.  If `fn` is an XLA-fusible elementwise chain, letting XLA
    # fuse `fn(x) + x` (3N bytes) beats a separate Pallas add (5N bytes); the
    # Pallas add is kept because it is the module under translation and its own
    # overhead is minimized (no pad/slice/astype, output aliases fn(x)'s buffer).
    return _pallas_elementwise(
        _residual_add_kernel, [y, x], out_dtype, x.shape, alias_first_input=True)


# ---------------------------------------------------------------------------
# Demo / self-test
# ---------------------------------------------------------------------------

if __name__ == "__main__":
    key = jax.random.PRNGKey(0)
    k_x, k_s, k_b = jax.random.split(key, 3)

    N, C, H, W = 2, 4, 16, 16
    x = jax.random.normal(k_x, (N, C, H, W), dtype=jnp.float32)

    # `fn` stands in for the wrapped sub-module (e.g. a conv / attention block
    # in diffusion.py): a deterministic per-channel affine followed by GELU.
    scale = 1.0 + 0.1 * jax.random.normal(k_s, (1, C, 1, 1), dtype=jnp.float32)
    shift = 0.1 * jax.random.normal(k_b, (1, C, 1, 1), dtype=jnp.float32)

    def fn_block(v):
        return jax.nn.gelu(v * scale + shift)

    # 1) Generic path: arbitrary fn runs as plain JAX, residual add in Pallas.
    generic = jax.jit(lambda v: residual(fn_block, v))
    out = jax.block_until_ready(generic(x))
    ref = fn_block(x) + x
    assert out.shape == x.shape and out.dtype == ref.dtype, (out.shape, out.dtype)
    err = float(jnp.max(jnp.abs(out - ref)))
    assert jnp.allclose(out, ref, atol=1e-5, rtol=1e-5), err

    # 2) Fused path: purely elementwise fn traced inside the kernel.
    fused = jax.jit(lambda v: residual(jax.nn.gelu, v, fuse=True))
    out_f = jax.block_until_ready(fused(x))
    ref_f = jax.nn.gelu(x) + x
    err_f = float(jnp.max(jnp.abs(out_f - ref_f)))
    assert jnp.allclose(out_f, ref_f, atol=1e-5, rtol=1e-5), err_f

    print("KERNEL_OK")
</pallas_src>

<mosaic_0001>
module attributes {stable_mosaic.version = 11 : i64} {
  func.func @_residual_add_kernel(%arg0: i32, %arg1: memref<4x512xf32, #tpu.memory_space<vmem>>, %arg2: memref<4x512xf32, #tpu.memory_space<vmem>>, %arg3: memref<4x512xf32, #tpu.memory_space<vmem>>) attributes {dimension_semantics = [#tpu.dimension_semantics<parallel>], iteration_bounds = array<i64: 1>, scalar_prefetch = 0 : i64, scratch_operands = 0 : i64, tpu.core_type = #tpu.core_type<tc>, window_params = [{transform_indices = @transform_0, window_bounds = array<i64: 4, 512>}, {transform_indices = @transform_1, window_bounds = array<i64: 4, 512>}, {transform_indices = @transform_2, window_bounds = array<i64: 4, 512>}]} {
    %c0 = arith.constant 0 : index
    %c0_0 = arith.constant 0 : index
    %0 = vector.load %arg1[%c0, %c0_0] : memref<4x512xf32, #tpu.memory_space<vmem>>, vector<4x512xf32>
    %c0_1 = arith.constant 0 : index
    %c0_2 = arith.constant 0 : index
    %1 = vector.load %arg2[%c0_1, %c0_2] : memref<4x512xf32, #tpu.memory_space<vmem>>, vector<4x512xf32>
    %2 = arith.addf %0, %1 : vector<4x512xf32>
    %c0_3 = arith.constant 0 : index
    %c0_4 = arith.constant 0 : index
    %3 = vector.load %arg3[%c0_3, %c0_4] : memref<4x512xf32, #tpu.memory_space<vmem>>, vector<4x512xf32>
    tpu.vector_store %arg3[%c0_3, %c0_4], %2 {strides = array<i32>} : memref<4x512xf32, #tpu.memory_space<vmem>>, vector<4x512xf32>,
    return
  }
  func.func @transform_0(%arg0: i32) -> (i32, i32) {
    %c0_i32 = arith.constant 0 : i32
    %c0_i32_0 = arith.constant 0 : i32
    return %arg0, %c0_i32 : i32, i32
  }
  func.func @transform_1(%arg0: i32) -> (i32, i32) {
    %c0_i32 = arith.constant 0 : i32
    %c0_i32_0 = arith.constant 0 : i32
    return %arg0, %c0_i32 : i32, i32
  }
  func.func @transform_2(%arg0: i32) -> (i32, i32) {
    %c0_i32 = arith.constant 0 : i32
    %c0_i32_0 = arith.constant 0 : i32
    return %arg0, %c0_i32 : i32, i32
  }
}

</mosaic_0001>

<bundles_post_ra>
// kernel: _lambda_.1
= control target key start
LH: loop header
LB: loop body
LE: loop exit
PB: predicated region body
PF: predicated region fallthrough
CT: control target
= control target key end

     0   :  { %7 = vsyncpa [#allocation3], 0  ;;  %s189_s0 = inlined_call_operand.hbm [shape: f32[4,512], index: 0, kind: input, shape index: {}, may-alias: {0,2}]   ;;  %s190_s1 = inlined_call_operand.hbm [shape: f32[4,512], index: 1, kind: input, shape index: {}]   ;;  %s191_s2 = inlined_call_operand.hbm [shape: f32[4,512], index: 2, kind: output, shape index: {}, may-alias: {0,2}]  }
   0x1   :  { %8 = vsyncpa [#allocation6], 0 }
   0x2   :  { %9 = vsyncpa [#allocation4], 0  ;;  %s135_s9 = smov [#allocation2]   ;;  %s136_s11 = smov [#allocation5]  }
   0x3   :  { %s16_s10 = sshll.u32 %s135_s9, 4  ;;  %s26_s12 = sshll.u32 %s136_s11, 4  ;;  %s17_s10 = int_to_ptr.vmem [resolvable:$true] %s16_s10  ;;  %s27_s12 = int_to_ptr.vmem [resolvable:$true] %s26_s12 }
   0x4   :  { %s63_s15 = scalar_lea.hbm %s189_s0, 256 }
   0x5   :  { %p64_p0 = scmp.ne.s32.totalorder %s189_s0, %s63_s15  ;;  %p67_p1 = scmp.lt.u32.totalorder %s63_s15, %s189_s0 }
   0x7   :  { %p69_p2 = pnand %p67_p1, %p64_p0 }
   0x9   :  { %72 = shalt.err (!%p69_p2)
}
   0xa   :  { %s73_s20 = scalar_lea.vmem %s17_s10, 256  ;;  %p78_p4 = scmp.lt.s32.totalorder %s17_s10, %s17_s10 }
   0xb   :  { %p74_p3 = scmp.ne.s32.totalorder %s17_s10, %s73_s20  ;;  %p79_p5 = scmp.lt.s32.totalorder %s73_s20, %s73_s20 }
   0xd   :  { %p80_p6 = por %p79_p5, %p78_p4 }
   0xf   :  { %p81_p7 = pnand %p80_p6, %p74_p3 }
  0x11   :  { %84 = shalt.err (!%p81_p7)
}
  0x12   :  { %19 = dma.hbm_to_vmem [thread:$0]  %s189_s0, 256, %s17_s10, [#allocation3]  }
  0x13   :  { %s85_s25 = scalar_lea.hbm %s190_s1, 256 }
  0x14   :  { %p86_p8 = scmp.ne.s32.totalorder %s190_s1, %s85_s25  ;;  %p89_p9 = scmp.lt.u32.totalorder %s85_s25, %s190_s1 }
  0x16   :  { %p91_p10 = pnand %p89_p9, %p86_p8 }
  0x18   :  { %94 = shalt.err (!%p91_p10)
}
  0x19   :  { %s95_s30 = scalar_lea.vmem %s27_s12, 256  ;;  %p100_p12 = scmp.lt.s32.totalorder %s27_s12, %s27_s12 }
  0x1a   :  { %p96_p11 = scmp.ne.s32.totalorder %s27_s12, %s95_s30  ;;  %p101_p13 = scmp.lt.s32.totalorder %s95_s30, %s95_s30 }
  0x1c   :  { %p102_p0 = por %p101_p13, %p100_p12 }
  0x1e   :  { %p103_p1 = pnand %p102_p0, %p96_p11 }
  0x20   :  { %106 = shalt.err (!%p103_p1)
}
  0x21   :  { %29 = dma.hbm_to_vmem [thread:$0]  %s190_s1, 256, %s27_s12, [#allocation6]  }
  0x22   :  { %129 = dma.done.wait [#allocation3], 256  }
  0x23   :  { %130 = vsyncadd [#allocation3], 4294967040 }
  0x24   :  { %131 = dma.done.wait [#allocation6], 256  }
  0x25   :  { %132 = vsyncadd [#allocation6], 4294967040  ;;  %s137_s4 = smov [#allocation7]   ;;  %v36_v0 = vld [vmem:[#allocation2] sm:$0xff]  ;;  %v38_v1 = vld [vmem:[#allocation5] sm:$0xff] }
  0x26   :  { %s50_s5 = sshll.u32 %s137_s4, 4  ;;  %v37_v2 = vld [vmem:[#allocation2 + $0x8] sm:$0xff]  ;;  %v40_v3 = vadd.f32 %v38_v1, %v36_v0  ;;  %v39_v4 = vld [vmem:[#allocation5 + $0x8] sm:$0xff]  ;;  %s51_s5 = int_to_ptr.vmem [resolvable:$true] %s50_s5 }
  0x27   :  { %v41_v5 = vadd.f32 %v39_v4, %v37_v2  ;;  %s107_s6 = scalar_lea.vmem %s51_s5, 256  ;;  %p112_p3 = scmp.lt.s32.totalorder %s51_s5, %s51_s5 }
  0x28   :  { %42 = vst [vmem:[#allocation7] sm:$0xff] %v40_v3  ;;  %p108_p2 = scmp.ne.s32.totalorder %s51_s5, %s107_s6  ;;  %p113_p4 = scmp.lt.s32.totalorder %s107_s6, %s107_s6 }
  0x29   :  { %43 = vst [vmem:[#allocation7 + $0x8] sm:$0xff] %v41_v5 }
  0x2a   :  { %p114_p5 = por %p113_p4, %p112_p3 }
  0x2c   :  { %p115_p6 = pnand %p114_p5, %p108_p2 }
  0x2e   :  { %118 = shalt.err (!%p115_p6)
}
  0x2f   :  { %s119_s8 = scalar_lea.hbm %s191_s2, 256 }
  0x30   :  { %p120_p7 = scmp.ne.s32.totalorder %s191_s2, %s119_s8  ;;  %p123_p8 = scmp.lt.u32.totalorder %s119_s8, %s191_s2 }
  0x32   :  { %p125_p9 = pnand %p123_p8, %p120_p7 }
  0x34   :  { %128 = shalt.err (!%p125_p9)
}
  0x35   :  { %53 = dma.vmem_to_hbm [thread:$0]  %s51_s5, 256, %s191_s2, [#allocation4]  }
  0x36   :  { %133 = dma.done.wait [#allocation4], 256  }
  0x37   :  { %134 = vsyncadd [#allocation4], 4294967040 }
  0x38   :  { %57 = vsyncpa [#allocation3], 1 }
  0x39   :  { %58 = vsyncpa [#allocation6], 1 }
  0x3a   :  { %59 = vsyncpa [#allocation4], 1 }

</bundles_post_ra>
